<compile_context>
chip_gen: v7x
topology: tpu7x:2x2x1
jax: 0.10.0
libtpu: 0.0.40
codegen_flags: <defaults>
</compile_context>

<pallas_src>
import functools
import math

import jax
import jax.numpy as jnp
from jax.experimental import pallas as pl
from jax.experimental.pallas import tpu as pltpu

SQRT_2_OVER_PI = 0.7978845608028654
GELU_C = 0.044715
_SUB = 16       # sublane alignment safe for both f32 (8) and bf16 (16) tiles
_LANE = 128


def _round_up(x, m):
    return ((x + m - 1) // m) * m


def _pad2(a, r, c):
    return jnp.pad(a, ((0, r - a.shape[0]), (0, c - a.shape[1])))


# ---------------------------------------------------------------------------
# Fused kernel: fc1 -> act -> fc2 -> channel scale (se)
# ---------------------------------------------------------------------------
def linear_adapter_kernel(x_ref, w1_ref, b1_ref, w2_ref, b2_ref, se_ref, o_ref,
                          *, act):
    x = x_ref[...].astype(jnp.bfloat16)                      # no-op if already bf16
    h = jnp.dot(x, w1_ref[...], preferred_element_type=jnp.float32) + b1_ref[...]
    # TODO(synk): act_layer is a constructor argument of the PyTorch module with
    # no default; relu, tanh-GELU and erf-GELU (torch nn.GELU default) provided.
    if act == "relu":
        a = jnp.maximum(h, 0.0)
    elif act == "gelu":            # exact (erf) form
        a = 0.5 * h * (1.0 + jax.lax.erf(h * (1.0 / math.sqrt(2.0))))
    elif act == "gelu_tanh":       # tanh approximation (EUP slot)
        a = 0.5 * h * (1.0 + jnp.tanh(SQRT_2_OVER_PI * (h + GELU_C * h * h * h)))
    else:
        raise ValueError(f"unsupported act: {act}")
    y = jnp.dot(a.astype(jnp.bfloat16), w2_ref[...],
                preferred_element_type=jnp.float32) + b2_ref[...]
    o_ref[...] = (y * se_ref[...]).astype(o_ref.dtype)


# ---------------------------------------------------------------------------
# One-time parameter preparation: lane-dense (128-multiple) padding + bf16 cast
# ---------------------------------------------------------------------------
def prepare_params(params):
    w1, b1 = params["w1"], params["b1"]
    w2, b2, se = params["w2"], params["b2"], params["se"]
    din, dh = w1.shape
    dout = w2.shape[1]
    dh_p, dout_p = _round_up(dh, _LANE), _round_up(dout, _LANE)
    # Zero-padded hidden units contribute act(0)*0 = 0; padded output columns
    # are sliced off after the kernel, so results are unchanged.
    return dict(
        w1=_pad2(w1, din, dh_p).astype(jnp.bfloat16),
        b1=_pad2(b1, 1, dh_p).astype(jnp.float32),
        w2=_pad2(w2, dh_p, dout_p).astype(jnp.bfloat16),
        b2=_pad2(b2, 1, dout_p).astype(jnp.float32),
        se=_pad2(se, 1, dout_p).astype(jnp.float32),
        din=din, dh=dh, dout=dout, dh_p=dh_p, dout_p=dout_p,
    )


# ---------------------------------------------------------------------------
# Wrapper: row tiling / pallas_call
# ---------------------------------------------------------------------------
def linear_adapter_forward(x, prep, *, act="gelu_tanh", out_dtype=None,
                           row_tile=256, target_steps=8):
    orig_shape = x.shape
    din, dout = prep["din"], prep["dout"]
    dh_p, dout_p = prep["dh_p"], prep["dout_p"]
    assert orig_shape[-1] == din, (orig_shape, din)
    rows = math.prod(orig_shape[:-1])
    out_dtype = x.dtype if out_dtype is None else out_dtype

    # Row tile: aim for ~target_steps grid steps (pipeline depth + megacore
    # balance), clamp to [64, row_tile], then rebalance so tail padding is
    # bounded by < 16 * n_tiles rows instead of up to row_tile-1.
    rows_a = _round_up(max(rows, 1), _SUB)
    rt = _round_up(pl.cdiv(rows_a, target_steps), _SUB)
    rt = max(64, min(rt, row_tile))
    rt = min(rt, rows_a)
    n_tiles = pl.cdiv(rows_a, rt)
    rt = _round_up(pl.cdiv(rows_a, n_tiles), _SUB)
    rows_p = n_tiles * rt

    x2d = x.reshape(rows, din)          # no dtype cast: keep producer's dtype
    if rows_p != rows:
        x2d = jnp.pad(x2d, ((0, rows_p - rows), (0, 0)))

    # Grid-invariant operands: fetched once -> single buffer is enough.
    def const_spec(shape):
        zeros = (0,) * len(shape)
        try:
            return pl.BlockSpec(shape, lambda i: zeros,
                                pipeline_mode=pl.Buffered(1)), 1
        except (TypeError, AttributeError):
            return pl.BlockSpec(shape, lambda i: zeros), 2

    w1_spec, w_buf = const_spec((din, dh_p))
    b1_spec, _ = const_spec((1, dh_p))
    w2_spec, _ = const_spec((dh_p, dout_p))
    b2_spec, _ = const_spec((1, dout_p))
    se_spec, _ = const_spec((1, dout_p))

    # VMEM budget derived from the actual block footprint (with headroom).
    xb = jnp.dtype(x.dtype).itemsize
    ob = jnp.dtype(out_dtype).itemsize
    est = (2 * rt * din * xb                              # x tile, double buffered
           + 2 * rt * dout_p * ob                         # out tile, double buffered
           + w_buf * 2 * (din * dh_p + dh_p * dout_p)     # bf16 weights
           + 3 * 4 * (dh_p + 2 * dout_p)                  # biases + se
           + 4 * rt * (2 * dh_p + dout_p))                # in-kernel f32 temporaries
    vmem_limit = int(min(max(2 * est, 32 << 20), 112 << 20))
    # TODO(synk): if din/dh grow large enough that the resident weights approach
    # v7x's 64 MiB VMEM, add a reduction grid axis over dh with a pl.when-init
    # f32 accumulator instead of keeping both full weight matrices resident.

    out_p = pl.pallas_call(
        functools.partial(linear_adapter_kernel, act=act),
        out_shape=jax.ShapeDtypeStruct((rows_p, dout_p), out_dtype),
        grid=(n_tiles,),
        in_specs=[
            pl.BlockSpec((rt, din), lambda i: (i, 0)),    # x row tile
            w1_spec, b1_spec, w2_spec, b2_spec, se_spec,  # grid-invariant
        ],
        out_specs=pl.BlockSpec((rt, dout_p), lambda i: (i, 0)),
        compiler_params=pltpu.CompilerParams(
            dimension_semantics=("parallel",),
            vmem_limit_bytes=vmem_limit),
    )(x2d, prep["w1"], prep["b1"], prep["w2"], prep["b2"], prep["se"])

    if rows_p != rows or dout_p != dout:                  # slice only if padded
        out_p = out_p[:rows, :dout]
    return out_p.reshape(*orig_shape[:-1], dout)


# ---------------------------------------------------------------------------
# Deterministic parameter init (shapes from LinearAdapter.__init__)
# ---------------------------------------------------------------------------
def init_params(key, inplanes, width, outplanes):
    k1, k2, k3, k4, k5 = jax.random.split(key, 5)
    s1 = 1.0 / math.sqrt(inplanes)
    s2 = 1.0 / math.sqrt(width)
    return dict(
        w1=jax.random.uniform(k1, (inplanes, width), jnp.float32, -s1, s1),
        b1=jax.random.uniform(k2, (1, width), jnp.float32, -s1, s1),
        w2=jax.random.uniform(k3, (width, outplanes), jnp.float32, -s2, s2),
        b2=jax.random.uniform(k4, (1, outplanes), jnp.float32, -s2, s2),
        # nn.Parameter(1.0 * torch.ones((1, outplanes))): init = ones; perturb
        # slightly so the channel-scale multiply is actually exercised.
        se=1.0 + 0.05 * jax.random.normal(k5, (1, outplanes), jnp.float32),
    )


# ---------------------------------------------------------------------------
# Pure-JAX reference (f32) for correctness check
# ---------------------------------------------------------------------------
def reference_forward(x, params, act="gelu_tanh"):
    h = x @ params["w1"] + params["b1"][0]
    if act == "relu":
        a = jnp.maximum(h, 0.0)
    elif act == "gelu":
        a = 0.5 * h * (1.0 + jax.lax.erf(h / math.sqrt(2.0)))
    else:
        a = 0.5 * h * (1.0 + jnp.tanh(SQRT_2_OVER_PI * (h + GELU_C * h ** 3)))
    y = a @ params["w2"] + params["b2"][0]
    return y * params["se"][0]


if __name__ == "__main__":
    B, N = 4, 128                               # rows = 512 -> 8 parallel grid steps
    inplanes, width, outplanes = 128, 64, 128   # width=64 exercises lane padding

    key = jax.random.PRNGKey(0)
    kx, kp = jax.random.split(key)
    # Upstream is assumed to hand over bf16 activations; feed them straight
    # through (halves the x DMA bytes vs. a forced f32 copy).
    x = jax.random.normal(kx, (B, N, inplanes), jnp.float32).astype(jnp.bfloat16)
    params = init_params(kp, inplanes, width, outplanes)

    prep = prepare_params(params)   # one-time pad + bf16 cast, not per forward

    fwd = jax.jit(functools.partial(linear_adapter_forward, prep=prep,
                                    act="gelu_tanh", out_dtype=jnp.float32))
    out = jax.block_until_ready(fwd(x))

    ref = reference_forward(x.astype(jnp.float32), params, act="gelu_tanh")
    err = float(jnp.max(jnp.abs(out - ref)))
    assert out.shape == (B, N, outplanes), out.shape
    assert err < 3e-2, f"max abs err {err}"     # bf16-operand matmul tolerance
    print("KERNEL_OK")
</pallas_src>

<mosaic_0001>
module attributes {stable_mosaic.version = 11 : i64} {
  func.func @linear_adapter_kernel(%arg0: i32, %arg1: memref<64x128xbf16, #tpu.memory_space<vmem>>, %arg2: memref<128x128xbf16, #tpu.memory_space<vmem>>, %arg3: memref<1x128xf32, #tpu.memory_space<vmem>>, %arg4: memref<128x128xbf16, #tpu.memory_space<vmem>>, %arg5: memref<1x128xf32, #tpu.memory_space<vmem>>, %arg6: memref<1x128xf32, #tpu.memory_space<vmem>>, %arg7: memref<64x128xf32, #tpu.memory_space<vmem>>) attributes {dimension_semantics = [#tpu.dimension_semantics<parallel>], iteration_bounds = array<i64: 8>, scalar_prefetch = 0 : i64, scratch_operands = 0 : i64, tpu.core_type = #tpu.core_type<tc>, window_params = [{transform_indices = @transform_0, window_bounds = array<i64: 64, 128>}, {pipeline_mode = #tpu.pipeline_mode<synchronous>, transform_indices = @transform_1, window_bounds = array<i64: 128, 128>}, {pipeline_mode = #tpu.pipeline_mode<synchronous>, transform_indices = @transform_2, window_bounds = array<i64: 1, 128>}, {pipeline_mode = #tpu.pipeline_mode<synchronous>, transform_indices = @transform_3, window_bounds = array<i64: 128, 128>}, {pipeline_mode = #tpu.pipeline_mode<synchronous>, transform_indices = @transform_4, window_bounds = array<i64: 1, 128>}, {pipeline_mode = #tpu.pipeline_mode<synchronous>, transform_indices = @transform_5, window_bounds = array<i64: 1, 128>}, {transform_indices = @transform_6, window_bounds = array<i64: 64, 128>}]} {
    %c0 = arith.constant 0 : index
    %c0_0 = arith.constant 0 : index
    %0 = vector.load %arg1[%c0, %c0_0] : memref<64x128xbf16, #tpu.memory_space<vmem>>, vector<64x128xbf16>
    %c0_1 = arith.constant 0 : index
    %c0_2 = arith.constant 0 : index
    %1 = vector.load %arg2[%c0_1, %c0_2] : memref<128x128xbf16, #tpu.memory_space<vmem>>, vector<128x128xbf16>
    %cst = arith.constant dense<0.000000e+00> : vector<64x128xf32>
    %2 = tpu.matmul %0, %1, %cst {dimension_numbers = #tpu.dot_dimension_numbers<[1], [0], [0], [1], [0, 0, 1, 1], [], []>} : vector<64x128xbf16>, vector<128x128xbf16>, vector<64x128xf32> -> vector<64x128xf32>
    %c0_3 = arith.constant 0 : index
    %c0_4 = arith.constant 0 : index
    %3 = vector.load %arg3[%c0_3, %c0_4] : memref<1x128xf32, #tpu.memory_space<vmem>>, vector<1x128xf32>
    %4 = vector.broadcast %3 : vector<1x128xf32> to vector<64x128xf32>
    %5 = arith.addf %2, %4 : vector<64x128xf32>
    %cst_5 = arith.constant 5.000000e-01 : f32
    %6 = vector.broadcast %cst_5 : f32 to vector<64x128xf32>
    %7 = arith.mulf %6, %5 : vector<64x128xf32>
    %cst_6 = arith.constant 4.471500e-02 : f32
    %8 = vector.broadcast %cst_6 : f32 to vector<64x128xf32>
    %9 = arith.mulf %8, %5 : vector<64x128xf32>
    %10 = arith.mulf %9, %5 : vector<64x128xf32>
    %11 = arith.mulf %10, %5 : vector<64x128xf32>
    %12 = arith.addf %5, %11 : vector<64x128xf32>
    %cst_7 = arith.constant 0.797884583 : f32
    %13 = vector.broadcast %cst_7 : f32 to vector<64x128xf32>
    %14 = arith.mulf %13, %12 : vector<64x128xf32>
    %15 = math.tanh %14 : vector<64x128xf32>
    %cst_8 = arith.constant 1.000000e+00 : f32
    %16 = vector.broadcast %cst_8 : f32 to vector<64x128xf32>
    %17 = arith.addf %16, %15 : vector<64x128xf32>
    %18 = arith.mulf %7, %17 : vector<64x128xf32>
    %19 = arith.truncf %18 : vector<64x128xf32> to vector<64x128xbf16>
    %c0_9 = arith.constant 0 : index
    %c0_10 = arith.constant 0 : index
    %20 = vector.load %arg4[%c0_9, %c0_10] : memref<128x128xbf16, #tpu.memory_space<vmem>>, vector<128x128xbf16>
    %cst_11 = arith.constant dense<0.000000e+00> : vector<64x128xf32>
    %21 = tpu.matmul %19, %20, %cst_11 {dimension_numbers = #tpu.dot_dimension_numbers<[1], [0], [0], [1], [0, 0, 1, 1], [], []>} : vector<64x128xbf16>, vector<128x128xbf16>, vector<64x128xf32> -> vector<64x128xf32>
    %c0_12 = arith.constant 0 : index
    %c0_13 = arith.constant 0 : index
    %22 = vector.load %arg5[%c0_12, %c0_13] : memref<1x128xf32, #tpu.memory_space<vmem>>, vector<1x128xf32>
    %23 = vector.broadcast %22 : vector<1x128xf32> to vector<64x128xf32>
    %24 = arith.addf %21, %23 : vector<64x128xf32>
    %c0_14 = arith.constant 0 : index
    %c0_15 = arith.constant 0 : index
    %25 = vector.load %arg6[%c0_14, %c0_15] : memref<1x128xf32, #tpu.memory_space<vmem>>, vector<1x128xf32>
    %26 = vector.broadcast %25 : vector<1x128xf32> to vector<64x128xf32>
    %27 = arith.mulf %24, %26 : vector<64x128xf32>
    %c0_16 = arith.constant 0 : index
    %c0_17 = arith.constant 0 : index
    %28 = vector.load %arg7[%c0_16, %c0_17] : memref<64x128xf32, #tpu.memory_space<vmem>>, vector<64x128xf32>
    tpu.vector_store %arg7[%c0_16, %c0_17], %27 {strides = array<i32>} : memref<64x128xf32, #tpu.memory_space<vmem>>, vector<64x128xf32>,
    return
  }
  func.func @transform_0(%arg0: i32) -> (i32, i32) {
    %c0_i32 = arith.constant 0 : i32
    %c0_i32_0 = arith.constant 0 : i32
    return %arg0, %c0_i32 : i32, i32
  }
  func.func @transform_1(%arg0: i32) -> (i32, i32) {
    %c0_i32 = arith.constant 0 : i32
    %c0_i32_0 = arith.constant 0 : i32
    %c0_i32_1 = arith.constant 0 : i32
    return %c0_i32, %c0_i32_0 : i32, i32
  }
  func.func @transform_2(%arg0: i32) -> (i32, i32) {
    %c0_i32 = arith.constant 0 : i32
    %c0_i32_0 = arith.constant 0 : i32
    %c0_i32_1 = arith.constant 0 : i32
    return %c0_i32, %c0_i32_0 : i32, i32
  }
  func.func @transform_3(%arg0: i32) -> (i32, i32) {
    %c0_i32 = arith.constant 0 : i32
    %c0_i32_0 = arith.constant 0 : i32
    %c0_i32_1 = arith.constant 0 : i32
    return %c0_i32, %c0_i32_0 : i32, i32
  }
  func.func @transform_4(%arg0: i32) -> (i32, i32) {
    %c0_i32 = arith.constant 0 : i32
    %c0_i32_0 = arith.constant 0 : i32
    %c0_i32_1 = arith.constant 0 : i32
    return %c0_i32, %c0_i32_0 : i32, i32
  }
  func.func @transform_5(%arg0: i32) -> (i32, i32) {
    %c0_i32 = arith.constant 0 : i32
    %c0_i32_0 = arith.constant 0 : i32
    %c0_i32_1 = arith.constant 0 : i32
    return %c0_i32, %c0_i32_0 : i32, i32
  }
  func.func @transform_6(%arg0: i32) -> (i32, i32) {
    %c0_i32 = arith.constant 0 : i32
    %c0_i32_0 = arith.constant 0 : i32
    return %arg0, %c0_i32 : i32, i32
  }
}

</mosaic_0001>

<bundles_post_ra>
// kernel: linear_adapter_forward.1
= control target key start
LH: loop header
LB: loop body
LE: loop exit
PB: predicated region body
PF: predicated region fallthrough
CT: control target
= control target key end

     0   :  { %11 = vsyncpa [#allocation3], 0  ;;  %s1526_s0 = inlined_call_operand.hbm [shape: bf16[512,128], index: 0, kind: input, shape index: {}]   ;;  %s1527_s1 = inlined_call_operand.hbm [shape: bf16[128,128], index: 1, kind: input, shape index: {}]   ;;  %s1528_s2 = inlined_call_operand.vmem [shape: f32[1,128], index: 2, kind: input, shape index: {}]   ;;  %s1529_s3 = inlined_call_operand.hbm [shape: bf16[128,128], index: 3, kind: input, shape index: {}]   ;;  %s1530_s4 = inlined_call_operand.vmem [shape: f32[1,128], index: 4, kind: input, shape index: {}]   ;;  %s1531_s5 = inlined_call_operand.vmem [shape: f32[1,128], index: 5, kind: input, shape index: {}]   ;;  %s1532_s6 = inlined_call_operand.hbm [shape: f32[512,128], index: 6, kind: output, shape index: {}]  }
   0x1   :  { %13 = vsyncpa [#allocation3 + $0x1], 0 }
   0x2   :  { %14 = vsyncpa [#allocation6], 0 }
   0x3   :  { %15 = vsyncpa [#allocation4], 0 }
   0x4   :  { %17 = vsyncpa [#allocation4 + $0x1], 0  ;;  %s1234_s21 = smov 0   ;;  %s1236_s22 = smov 0  }
   0x5   :  { %s1238_s23 = smov 0   ;;  %s1240_s24 = smov 0  }
   0x6 LB: > { %s1255_s25 = sadd.s32 4294967295, %s1189_s24   ;;  %s811_s26 = sadd.s32 4294967294, %s1189_s24   ;;  %s1189_s24 = sphi %s1240_s24, %s1551_s24   ;;  %s1185_s23 = sphi %s1238_s23, %s1550_s23   ;;  %s1181_s22 = sphi %s1236_s22, %s1549_s22   ;;  %s1177_s21 = sphi %s1234_s21, %s1548_s21  }
   0x7   : > { %p43_p0 = scmp.ne.s32.totalorder %s1181_s22, %s1177_s21  ;;  %p1533_p1 = scmp.eq.s32.totalorder %s1255_s25, 0 }
   0x8   : > { %p178_p3 = scmp.eq.s32.totalorder %s811_s26, 7  ;;  %p812_p5 = scmp.ge.s32.totalorder %s1189_s24, 1 }
   0x9   : > { %p1264_p4 = por %p1533_p1, %p43_p0  ;;  %p185_p7 = scmp.lt.s32.totalorder %s1189_s24, 9 }
   0xa   : > { %p1269_p6 = por %p178_p3, %p43_p0  ;;  %s1191_s30 = smov [#allocation5]  }
   0xb   : > { %s1536_s27 = scalar_select %p1264_p4, 1, 0 }
   0xc   : > { %s1537_s28 = scalar_select %p1269_p6, 1, 0 }
   0xd   : > { %p1274_p8 = pnand %p812_p5, %p185_p7  ;;  %s197_s7 = sshll.u32 %s1191_s30, 4  ;;  %s198_s7 = int_to_ptr.vmem [resolvable:$true] %s197_s7 }
   0xe   : > { %s1192_s9 = smov [#allocation7]   ;;  %s1033_s13 = scalar_lea.hbm %s1527_s1, 1024 }
   0xf   : > { %s1538_s29 = scalar_select %p1274_p8, 1, 0 }
  0x10   : > { %p938_p9 = pneg %p1274_p8  ;;  %s213_s10 = sshll.u32 %s1192_s9, 4  ;;  %s1286_s10 = int_to_ptr.vmem [resolvable:$true] %s213_s10 }
  0x11   : > { %p1034_p11 = scmp.ne.s32.totalorder %s1527_s1, %s1033_s13  ;;  %p1040_p3 = scmp.lt.u32.totalorder %s1033_s13, %s1527_s1 }
  0x12   : > { %p1282_p10 = pnand %p938_p9, %p1533_p1 }
  0x14   : > { %p1035_p12 = pneg %p1282_p10 }
  0x16   : > { %p1036_p13 = pnand %p1035_p12, %p1034_p11 }
  0x18   : > { %p1037_p0 = pneg %p1036_p13 }
  0x1a   : > { %p1042_p5 = pnand %p1040_p3, %p1037_p0 }
  0x1c   : > { %1045 = shalt.err (!%p1042_p5)
}
  0x1d   : > { %s1046_s18 = scalar_lea.vmem %s198_s7, 1024  ;;  %p1054_p2 = scmp.lt.s32.totalorder %s198_s7, %s198_s7 }
  0x1e   : > { %p1047_p7 = scmp.ne.s32.totalorder %s198_s7, %s1046_s18  ;;  %p1055_p6 = scmp.lt.s32.totalorder %s1046_s18, %s1046_s18 }
  0x20   : > { %p1049_p9 = pnand %p1047_p7, %p1035_p12  ;;  %p1056_p4 = por %p1055_p6, %p1054_p2 }
  0x22   : > { %p1050_p1 = pneg %p1049_p9 }
  0x24   : > { %p1057_p8 = pnand %p1056_p4, %p1050_p1 }
  0x26   : > { %1060 = shalt.err (!%p1057_p8)
}
  0x27   : > { %s1193_s19 = smov 64   ;;  %s1194_s20 = smov 4  }
  0x28   : > { %941 = dma.hbm_to_vmem [thread:$0]  (!%p1282_p10), %s1527_s1, 1024, %s198_s7, [#allocation6], %s1193_s19, %s1193_s19, %s1194_s20  }
  0x29   : > { %s1061_s12 = scalar_lea.hbm %s1529_s3, 1024 }
  0x2a   : > { %p1062_p1 = scmp.ne.s32.totalorder %s1529_s3, %s1061_s12  ;;  %p1068_p6 = scmp.lt.u32.totalorder %s1061_s12, %s1529_s3 }
  0x2c   : > { %p1064_p2 = pnand %p1062_p1, %p1035_p12 }
  0x2e   : > { %p1065_p4 = pneg %p1064_p2 }
  0x30   : > { %p1070_p8 = pnand %p1068_p6, %p1065_p4 }
  0x32   : > { %1073 = shalt.err (!%p1070_p8)
}
  0x33   : > { %s1074_s7 = scalar_lea.vmem %s1286_s10, 1024  ;;  %p1082_p3 = scmp.lt.s32.totalorder %s1286_s10, %s1286_s10 }
  0x34   : > { %p1075_p11 = scmp.ne.s32.totalorder %s1286_s10, %s1074_s7  ;;  %p1083_p5 = scmp.lt.s32.totalorder %s1074_s7, %s1074_s7 }
  0x36   : > { %p1077_p13 = pnand %p1075_p11, %p1035_p12  ;;  %p1084_p7 = por %p1083_p5, %p1082_p3 }
  0x38   : > { %p1078_p0 = pneg %p1077_p13 }
  0x3a   : > { %p1085_p9 = pnand %p1084_p7, %p1078_p0 }
  0x3c   : > { %1088 = shalt.err (!%p1085_p9)
}
  0x3d   : > { %944 = dma.hbm_to_vmem [thread:$0]  (!%p1282_p10), %s1529_s3, 1024, %s1286_s10, [#allocation6], %s1193_s19, %s1193_s19, %s1194_s20  }
  0x3e   : > { %s1342_s8 = sadd.s32 1, %s1189_s24   ;;  %s30_s26 = sadd.s32 1, %s1185_s23 }
  0x3f   : > { %s27_s30 = ssub.s32 %s1189_s24, %s1342_s8  ;;  %p37_p12 = scmp.ne.s32.totalorder %s1185_s23, %s1181_s22 }
  0x40   : > { %p28_p1 = scmp.eq.s32.totalorder %s27_s30, 0  ;;  %p38_p2 = scmp.eq.s32.totalorder %s1189_s24, 0 }
  0x41   : > { %p1540_p4 = scmp.eq.s32.totalorder %s1255_s25, 7  ;;  %p955_p8 = scmp.lt.s32.totalorder %s1189_s24, 8 }
  0x42   : > { %s1358_s11 = scalar_select %p28_p1, %s1185_s23, %s30_s26  }
  0x43   : > { %p1352_p6 = por %p1540_p4, %p37_p12  ;;  %p39_p11 = por %p38_p2, %p37_p12 }
  0x44   : > { %s233_s12 = sand.u32 1, %s1185_s23   ;;  %s852_s10 = sshll.u32 %s1189_s24, 9 }
  0x45   : > { %s816_s13 = sshll.u32 %s233_s12, 5  ;;  %s1365_s16 = scalar_lea.hbm %s1526_s0, %s852_s10 }
  0x46   : > { %s237_s7 = scalar_lea.vmem [#allocation2], %s816_s13  ;;  %p1369_p10 = pnand %p955_p8, %p39_p11 }
  0x47   : > { %s244_s17 = sshll.u32 %s237_s7, 4  ;;  %s1373_s26 = scalar_lea.sflag [#allocation3], %s233_s12  ;;  %s1367_s17 = int_to_ptr.vmem [resolvable:$true] %s244_s17 }
  0x48   : > { %s1089_s30 = scalar_lea.hbm %s1365_s16, 512  ;;  %p1091_p0 = pneg %p1369_p10 }
  0x49   : > { %p1090_p13 = scmp.ne.s32.totalorder %s1365_s16, %s1089_s30  ;;  %s1094_s14 = scalar_lea.hbm %s1526_s0, 4096 }
  0x4a   : > { %p1095_p7 = scmp.lt.u32.totalorder %s1365_s16, %s1526_s0  ;;  %p1096_p9 = scmp.lt.u32.totalorder %s1094_s14, %s1089_s30 }
  0x4b   : > { %p1092_p3 = pnand %p1091_p0, %p1090_p13  ;;  %p1098_p1 = scmp.lt.u32.totalorder %s1089_s30, %s1365_s16 }
  0x4c   : > { %p1097_p12 = por %p1096_p9, %p1095_p7 }
  0x4d   : > { %p1093_p5 = pneg %p1092_p3 }
  0x4e   : > { %p1099_p2 = por %p1098_p1, %p1097_p12 }
  0x50   : > { %p1100_p4 = pnand %p1099_p2, %p1093_p5 }
  0x52   : > { %1103 = shalt.err (!%p1100_p4)
}
  0x53   : > { %s1104_s12 = scalar_lea.vmem %s1367_s17, 512  ;;  %s1195_s13 = smov [#allocation2]  }
  0x54   : > { %p1105_p8 = scmp.ne.s32.totalorder %s1367_s17, %s1104_s12  ;;  %s1109_s10 = sshll.u32 %s1195_s13, 4  ;;  %s1110_s10 = int_to_ptr.vmem [resolvable:$false] %s1109_s10 }
  0x55   : > { %s1111_s15 = scalar_lea.vmem %s1110_s10, 1024  ;;  %p1112_p3 = scmp.lt.s32.totalorder %s1367_s17, %s1110_s10 }
  0x56   : > { %p1107_p11 = pnand %p1105_p8, %p1091_p0  ;;  %p1113_p7 = scmp.lt.s32.totalorder %s1111_s15, %s1104_s12 }
  0x58   : > { %p1108_p13 = pneg %p1107_p11  ;;  %p1114_p9 = por %p1113_p7, %p1112_p3 }
  0x5a   : > { %p1115_p12 = pnand %p1114_p9, %p1108_p13 }
  0x5c   : > { %1118 = shalt.err (!%p1115_p12)
}
  0x5d   : > { %948 = dma.hbm_to_vmem [thread:$0]  (!%p1369_p10), %s1365_s16, 512, %s1367_s17, %s1373_s26, %s1193_s19, %s1193_s19, %s1194_s20  }
  0x5e   : > { %p1543_p0 = scmp.ne.s32.totalorder %s1538_s29, 0 }
  0x5f   : > { %s1407_s30 = sand.u32 (!%p1543_p0), 1, %s1181_s22   ;;  %p1544_p5 = scmp.ne.s32.totalorder (!%p1543_p0), %s1536_s27, 0 }
  0x60   : > { %256 = sbr.rel (%p1543_p0) target bundleno = 627 (0x273), region = 44  ;;  %s820_s14 = sshll.u32 (!%p1543_p0), %s1407_s30, 5 }
  0x61   : > { %s259_s7 = scalar_lea.sflag (!%p1543_p0), [#allocation3], %s1407_s30  ;;  %s1411_s12 = scalar_lea.vmem (!%p1543_p0), [#allocation2], %s820_s14 }
  0x67   : > { %1164 = dma.done.wait (%p1544_p5), %s259_s7, 512  }
  0x68   : > { %1166 = vsyncadd (%p1544_p5), %s259_s7, 4294966784  ;;  %p1545_p10 = scmp.eq.s32.totalorder %s1255_s25, 0 }
  0x6a   : > { %1168 = dma.done.wait (%p1545_p10), [#allocation6], 2048   ;;  %p1546_p1 = pmov %p1545_p10 }
  0x6b   : > { %v997_v0 = vld [vmem:[#allocation5] sm:$0xff]   ;;  %v998_v1 = vld [vmem:[#allocation5 + $0x8] sm:$0xff]   ;;  %v999_v2 = vld [vmem:[#allocation5 + $0x10] sm:$0xff]   ;;  %s823_s16 = sshll.u32 %s1407_s30, 6  ;;  %s853_s10 = sshll.u32 %s1255_s25, 10 }
  0x6c   : > { %1170 = vsyncadd (%p1546_p1), [#allocation6], 4294965248  ;;  %878 = vmatprep.subr.bf16.mxu0 %v997_v0  ;;  %v1000_v3 = vld [vmem:[#allocation5 + $0x18] sm:$0xff]   ;;  %v1005_v4 = vld [vmem:[%s1411_s12] sm:$0xff]   ;;  %s298_s26 = scalar_lea.vmem [#allocation8], %s823_s16  ;;  %s1483_s7 = scalar_lea.hbm %s1532_s6, %s853_s10 }
  0x6d   : > { %879 = vmatpush3.bf16.msra.mxu0 %v997_v0  ;;  %894 = vmatprep.mubr.bf16.mxu0 %v1005_v4  ;;  %v1001_v5 = vld [vmem:[#allocation5 + $0x20] sm:$0xff]   ;;  %v1002_v6 = vld [vmem:[#allocation5 + $0x28] sm:$0xff]   ;;  %v1003_v7 = vld [vmem:[#allocation5 + $0x30] sm:$0xff]   ;;  %s719_s13 = sshll.u32 %s298_s26, 4  ;;  %s706_s25 = scalar_lea.sflag [#allocation4], %s1407_s30  ;;  %s1478_s13 = int_to_ptr.vmem [resolvable:$true] %s719_s13 }
  0x6e   : > { %880 = vmatprep.subr.bf16.mxu0 %v998_v1  ;;  %v1004_v8 = vld [vmem:[#allocation5 + $0x38] sm:$0xff]   ;;  %v1006_v9 = vld [vmem:[%s1411_s12 + $0x8] sm:$0xff]   ;;  %v1007_v10 = vld [vmem:[%s1411_s12 + $0x10] sm:$0xff]   ;;  %s1196_s27 = smov [#allocation8]  }
  0x6f   : > { %v1008_v11 = vld [vmem:[%s1411_s12 + $0x18] sm:$0xff]   ;;  %v1009_v12 = vld [vmem:[#allocation7] sm:$0xff]   ;;  %v1010_v13 = vld [vmem:[#allocation7 + $0x8] sm:$0xff]   ;;  %s1119_s12 = scalar_lea.vmem %s1478_s13, 1024  ;;  %s1123_s29 = sshll.u32 %s1196_s27, 4  ;;  %s1124_s29 = int_to_ptr.vmem [resolvable:$false] %s1123_s29 }
  0x70   : > { %902 = vmatprep.subr.bf16.mxu1 %v1009_v12  ;;  %v1011_v14 = vld [vmem:[#allocation7 + $0x10] sm:$0xff]   ;;  %v1012_v15 = vld [vmem:[#allocation7 + $0x18] sm:$0xff]   ;;  %v1013_v16 = vld [vmem:[#allocation7 + $0x20] sm:$0xff]   ;;  %p1120_p2 = scmp.ne.s32.totalorder %s1478_s13, %s1119_s12  ;;  %s1125_s19 = scalar_lea.vmem %s1124_s29, 2048 }
  0x71   : > { %881 = vmatpush3.bf16.msra.mxu0 %v998_v1  ;;  %903 = vmatpush3.bf16.msra.mxu1 %v1009_v12  ;;  %v1014_v17 = vld [vmem:[#allocation7 + $0x28] sm:$0xff]   ;;  %v1015_v18 = vld [vmem:[#allocation7 + $0x30] sm:$0xff]   ;;  %v1016_v19 = vld [vmem:[#allocation7 + $0x38] sm:$0xff]   ;;  %p1126_p11 = scmp.lt.s32.totalorder %s1478_s13, %s1124_s29  ;;  %p1127_p13 = scmp.lt.s32.totalorder %s1125_s19, %s1119_s12 }
  0x72   : > { %882 = vmatprep.subr.bf16.mxu0 %v999_v2  ;;  %904 = vmatprep.subr.bf16.mxu1 %v1010_v13  ;;  %v824_v20 = vld [vmem:[%s1528_s2] ss:$0 sm:$0xff]  ;;  %p1121_p4 = pnand %p1120_p2, %p1352_p6 }
  0x73   : > { %p1128_p3 = por %p1127_p13, %p1126_p11 }
  0x74   : > { %p1122_p8 = pneg %p1121_p4 }
  0x75   : > { %883 = vmatpush3.bf16.msra.mxu0 %v999_v2  ;;  %905 = vmatpush3.bf16.msra.mxu1 %v1010_v13 }
  0x76   : > { %884 = vmatprep.subr.bf16.mxu0 %v1000_v3  ;;  %906 = vmatprep.subr.bf16.mxu1 %v1011_v14  ;;  %p1129_p7 = pnand %p1128_p3, %p1122_p8 }
  0x79   : > { %885 = vmatpush3.bf16.msra.mxu0 %v1000_v3  ;;  %907 = vmatpush3.bf16.msra.mxu1 %v1011_v14 }
  0x7a   : > { %886 = vmatprep.subr.bf16.mxu0 %v1001_v5  ;;  %908 = vmatprep.subr.bf16.mxu1 %v1012_v15 }
  0x7d   : > { %887 = vmatpush3.bf16.msra.mxu0 %v1001_v5  ;;  %909 = vmatpush3.bf16.msra.mxu1 %v1012_v15 }
  0x7e   : > { %888 = vmatprep.subr.bf16.mxu0 %v1002_v6  ;;  %910 = vmatprep.subr.bf16.mxu1 %v1013_v16 }
  0x81   : > { %889 = vmatpush3.bf16.msra.mxu0 %v1002_v6  ;;  %911 = vmatpush3.bf16.msra.mxu1 %v1013_v16 }
  0x82   : > { %890 = vmatprep.subr.bf16.mxu0 %v1003_v7  ;;  %912 = vmatprep.subr.bf16.mxu1 %v1014_v17 }
  0x85   : > { %891 = vmatpush3.bf16.msra.mxu0 %v1003_v7  ;;  %913 = vmatpush3.bf16.msra.mxu1 %v1014_v17 }
  0x86   : > { %892 = vmatprep.subr.bf16.mxu0 %v1004_v8  ;;  %914 = vmatprep.subr.bf16.mxu1 %v1015_v18 }
  0x89   : > { %893 = vmatpush3.bf16.msra.mxu0 %v1004_v8  ;;  %915 = vmatpush3.bf16.msra.mxu1 %v1015_v18 }
  0x8a   : > { %916 = vmatprep.subr.bf16.mxu1 %v1016_v19 }
  0x8c   : > { %895 = vmatmul.mubr.bf16.vlgmr.msra.gmra.mrb[0].mxu0 %v1006_v9 }
  0x8d   : > { %898 = vmatprep.mubr.bf16.mxu0 %v1007_v10  ;;  %917 = vmatpush3.bf16.msra.mxu1 %v1016_v19 }
  0x94   : > { %899 = vmatmul.mubr.bf16.gmra.mrb[4].mxu0 %v1008_v11 }
 0x15f   : > { %v896_v21 = vpop.f32.mrb[0].mxu0 }
 0x160   : > { %v1428_v22 = vadd.f32 %v896_v21, %v824_v20  ;;  %v439_v23 = vpop.f32.mrb[1].mxu0 }
 0x161   : > { %v1430_v24 = vadd.f32 %v824_v20, %v439_v23  ;;  %v897_v25 = vpop.f32.mrb[2].mxu0 }
 0x162   : > { %v480_v26 = vmul.f32 0.044715, %v1428_v22  ;;  %v1433_v27 = vadd.f32 %v897_v25, %v824_v20  ;;  %v442_v28 = vpop.f32.mrb[3].mxu0  ;;  %v472_v19 = vmul.f32 0.5, %v1428_v22 }
 0x163   : > { %v478_v29 = vmul.f32 0.044715, %v1430_v24  ;;  %v1436_v30 = vadd.f32 %v824_v20, %v442_v28  ;;  %v470_v23 = vmul.f32 0.5, %v1430_v24 }
 0x164   : > { %v488_v31 = vmul.f32 %v480_v26, %v1428_v22  ;;  %v481_v32 = vmul.f32 0.044715, %v1433_v27 }
 0x165   : > { %v479_v33 = vmul.f32 0.044715, %v1436_v30  ;;  %v486_v34 = vmul.f32 %v478_v29, %v1430_v24  ;;  %v471_v25 = vmul.f32 0.5, %v1436_v30 }
 0x166   : > { %v496_v35 = vmul.f32 %v488_v31, %v1428_v22  ;;  %v489_v36 = vmul.f32 %v481_v32, %v1433_v27 }
 0x167   : > { %v900_v37 = vpop.f32.mrb[4].mxu0  ;;  %v487_v38 = vmul.f32 %v479_v33, %v1436_v30  ;;  %v494_v39 = vmul.f32 %v486_v34, %v1430_v24 }
 0x168   : > { %v497_v40 = vmul.f32 %v489_v36, %v1433_v27  ;;  %v1447_v41 = vadd.f32 %v900_v37, %v824_v20  ;;  %v455_v42 = vpop.f32.mrb[5].mxu0  ;;  %v504_v43 = vadd.f32 %v496_v35, %v1428_v22 }
 0x169   : > { %v1450_v44 = vadd.f32 %v824_v20, %v455_v42  ;;  %v901_v45 = vpop.f32.mrb[6].mxu0  ;;  %v495_v46 = vmul.f32 %v487_v38, %v1436_v30  ;;  %v502_v47 = vadd.f32 %v494_v39, %v1430_v24 }
 0x16a   : > { %v484_v48 = vmul.f32 0.044715, %v1447_v41  ;;  %v467_v49 = vadd.f32 %v901_v45, %v824_v20  ;;  %v458_v50 = vpop.f32.mrb[7].mxu0  ;;  %v505_v51 = vadd.f32 %v497_v40, %v1433_v27  ;;  %v512_v52 = vmul.f32 0.7978846, %v504_v43 }
 0x16b   : > { %v482_v53 = vmul.f32 0.044715, %v1450_v44  ;;  %v459_v54 = vadd.f32 %v824_v20, %v458_v50  ;;  %v503_v55 = vadd.f32 %v495_v46, %v1436_v30  ;;  %v510_v56 = vmul.f32 0.7978846, %v502_v47 }
 0x16c   : > { %v492_v57 = vmul.f32 %v484_v48, %v1447_v41  ;;  %v485_v58 = vmul.f32 0.044715, %v467_v49  ;;  %v513_v59 = vmul.f32 0.7978846, %v505_v51  ;;  %1017 = vtanh.f32 %v512_v52  ;;  %v837_v52 = vld [vmem:[%s1530_s4] ss:$0 sm:$0xff] }
 0x16d   : > { %v490_v60 = vmul.f32 %v482_v53, %v1450_v44  ;;  %v483_v61 = vmul.f32 0.044715, %v459_v54  ;;  %v511_v62 = vmul.f32 0.7978846, %v503_v55  ;;  %1019 = vtanh.f32 %v510_v56 }
 0x16e   : > { %v500_v63 = vmul.f32 %v492_v57, %v1447_v41  ;;  %v493_v0 = vmul.f32 %v485_v58, %v467_v49  ;;  %1021 = vtanh.f32 %v513_v59  ;;  %v473_v20 = vmul.f32 0.5, %v1433_v27 }
 0x16f   : > { %v498_v1 = vmul.f32 %v490_v60, %v1450_v44  ;;  %v491_v2 = vmul.f32 %v483_v61, %v459_v54  ;;  %1023 = vtanh.f32 %v511_v62  ;;  %v476_v24 = vmul.f32 0.5, %v1447_v41 }
 0x170   : > { %v501_v3 = vmul.f32 %v493_v0, %v467_v49  ;;  %v508_v4 = vadd.f32 %v500_v63, %v1447_v41  ;;  %v477_v27 = vmul.f32 0.5, %v467_v49  ;;  %v474_v40 = vmul.f32 0.5, %v1450_v44 }
 0x171   : > { %v499_v5 = vmul.f32 %v491_v2, %v459_v54  ;;  %v506_v6 = vadd.f32 %v498_v1, %v1450_v44  ;;  %v475_v42 = vmul.f32 0.5, %v459_v54  ;;  %v846_v44 = vld [vmem:[%s1531_s5] ss:$0 sm:$0xff] }
 0x172   : > { %v509_v7 = vadd.f32 %v501_v3, %v467_v49  ;;  %v516_v8 = vmul.f32 0.7978846, %v508_v4 }
 0x173   : > { %v507_v9 = vadd.f32 %v499_v5, %v459_v54  ;;  %v514_v10 = vmul.f32 0.7978846, %v506_v6 }
 0x174   : > { %v517_v11 = vmul.f32 0.7978846, %v509_v7  ;;  %1025 = vtanh.f32 %v516_v8 }
 0x175   : > { %v515_v12 = vmul.f32 0.7978846, %v507_v9  ;;  %1027 = vtanh.f32 %v514_v10 }
 0x176   : > { %v1018_v13 = vpop.eup %1017  ;;  %1029 = vtanh.f32 %v517_v11 }
 0x177   : > { %v1020_v14 = vpop.eup %1019  ;;  %v528_v15 = vadd.f32 1.0, %v1018_v13  ;;  %1031 = vtanh.f32 %v515_v12 }
 0x178   : > { %v1022_v16 = vpop.eup %1021  ;;  %v526_v17 = vadd.f32 1.0, %v1020_v14 }
 0x179   : > { %v1024_v18 = vpop.eup %1023  ;;  %v529_v21 = vadd.f32 1.0, %v1022_v16  ;;  %v536_v28 = vmul.f32 %v528_v15, %v472_v19 }
 0x17a   : > { %v527_v26 = vadd.f32 1.0, %v1024_v18  ;;  %v534_v31 = vmul.f32 %v526_v17, %v470_v23 }
 0x17b   : > { %v537_v29 = vmul.f32 %v529_v21, %v473_v20 }
 0x17c   : > { %v535_v32 = vmul.f32 %v527_v26, %v471_v25 }
 0x17d   : > { %v543_v33 = vpack.c.bf16 %v537_v29, %v536_v28 }
 0x17e   : > { %v1026_v34 = vpop.eup %1025  ;;  %v542_v35 = vpack.c.bf16 %v535_v32, %v534_v31 }
 0x17f   : > { %v1028_v36 = vpop.eup %1027  ;;  %v532_v37 = vadd.f32 1.0, %v1026_v34 }
 0x180   : > { %v1030_v38 = vpop.eup %1029  ;;  %918 = vmatprep.mubr.bf16.mxu1 %v542_v35  ;;  %v530_v22 = vadd.f32 1.0, %v1028_v36 }
 0x181   : > { %v1032_v39 = vpop.eup %1031  ;;  %919 = vmatmul.mubr.bf16.vlgmr.msra.gmra.mrb[0].mxu1 %v543_v33  ;;  %v533_v30 = vadd.f32 1.0, %v1030_v38  ;;  %v540_v45 = vmul.f32 %v532_v37, %v476_v24 }
 0x182   : > { %v531_v43 = vadd.f32 1.0, %v1032_v39  ;;  %v538_v47 = vmul.f32 %v530_v22, %v474_v40 }
 0x183   : > { %v541_v46 = vmul.f32 %v533_v30, %v477_v27 }
 0x184   : > { %v539_v48 = vmul.f32 %v531_v43, %v475_v42 }
 0x185   : > { %v545_v50 = vpack.c.bf16 %v541_v46, %v540_v45 }
 0x186   : > { %v544_v51 = vpack.c.bf16 %v539_v48, %v538_v47 }
 0x188   : > { %922 = vmatprep.mubr.bf16.mxu1 %v544_v51 }
 0x189   : > { %923 = vmatmul.mubr.bf16.gmra.mrb[4].mxu1 %v545_v50 }
 0x254   : > { %v920_v41 = vpop.f32.mrb[0].mxu1 }
 0x255   : > { %v660_v49 = vadd.f32 %v920_v41, %v837_v52  ;;  %v651_v53 = vpop.f32.mrb[1].mxu1 }
 0x256   : > { %v652_v54 = vadd.f32 %v837_v52, %v651_v53  ;;  %v921_v55 = vpop.f32.mrb[2].mxu1 }
 0x257   : > { %v691_v56 = vmul.f32 %v846_v44, %v660_v49  ;;  %v663_v57 = vadd.f32 %v921_v55, %v837_v52  ;;  %v654_v58 = vpop.f32.mrb[3].mxu1 }
 0x258   : > { %v689_v59 = vmul.f32 %v846_v44, %v652_v54  ;;  %v655_v60 = vadd.f32 %v837_v52, %v654_v58 }
 0x259   : > { %699 = vst [vmem:[%s298_s26 + $0x10] sm:$0xff] %v691_v56  ;;  %v692_v61 = vmul.f32 %v846_v44, %v663_v57 }
 0x25a   : > { %697 = vst [vmem:[%s298_s26] sm:$0xff] %v689_v59  ;;  %v690_v62 = vmul.f32 %v846_v44, %v655_v60 }
 0x25b   : > { %700 = vst [vmem:[%s298_s26 + $0x18] sm:$0xff] %v692_v61 }
 0x25c   : > { %698 = vst [vmem:[%s298_s26 + $0x8] sm:$0xff] %v690_v62  ;;  %v924_v63 = vpop.f32.mrb[4].mxu1 }
 0x25d   : > { %v676_v0 = vadd.f32 %v924_v63, %v837_v52  ;;  %v667_v1 = vpop.f32.mrb[5].mxu1 }
 0x25e   : > { %v668_v2 = vadd.f32 %v837_v52, %v667_v1  ;;  %v925_v3 = vpop.f32.mrb[6].mxu1 }
 0x25f   : > { %v695_v4 = vmul.f32 %v846_v44, %v676_v0  ;;  %v679_v5 = vadd.f32 %v925_v3, %v837_v52  ;;  %v670_v6 = vpop.f32.mrb[7].mxu1 }
 0x260   : > { %v693_v7 = vmul.f32 %v846_v44, %v668_v2  ;;  %v671_v8 = vadd.f32 %v837_v52, %v670_v6 }
 0x261   : > { %703 = vst [vmem:[%s298_s26 + $0x30] sm:$0xff] %v695_v4  ;;  %v696_v9 = vmul.f32 %v846_v44, %v679_v5 }
 0x262   : > { %701 = vst [vmem:[%s298_s26 + $0x20] sm:$0xff] %v693_v7  ;;  %v694_v10 = vmul.f32 %v846_v44, %v671_v8 }
 0x263   : > { %704 = vst [vmem:[%s298_s26 + $0x38] sm:$0xff] %v696_v9 }
 0x264   : > { %702 = vst [vmem:[%s298_s26 + $0x28] sm:$0xff] %v694_v10 }
 0x265   : > { %1132 = shalt.err (!%p1129_p7)
}
 0x266   : > { %s1133_s20 = scalar_lea.hbm %s1483_s7, 1024  ;;  %s1137_s18 = scalar_lea.hbm %s1532_s6, 8192 }
 0x267   : > { %p1134_p9 = scmp.ne.s32.totalorder %s1483_s7, %s1133_s20  ;;  %p1138_p5 = scmp.lt.u32.totalorder %s1483_s7, %s1532_s6 }
 0x268   : > { %p1139_p10 = scmp.lt.u32.totalorder %s1137_s18, %s1133_s20  ;;  %p1141_p2 = scmp.lt.u32.totalorder %s1133_s20, %s1483_s7 }
 0x269   : > { %p1135_p12 = pnand %p1134_p9, %p1352_p6 }
 0x26a   : > { %p1140_p1 = por %p1139_p10, %p1138_p5 }
 0x26b   : > { %p1136_p0 = pneg %p1135_p12 }
 0x26c   : > { %p1142_p4 = por %p1141_p2, %p1140_p1 }
 0x26e   : > { %p1143_p8 = pnand %p1142_p4, %p1136_p0 }
 0x270   : > { %1146 = shalt.err (!%p1143_p8)
}
 0x271   : > { %s1197_s15 = smov 128   ;;  %s1198_s14 = smov 8  }
 0x272   : > { %936 = dma.vmem_to_hbm [thread:$0]  (%p1352_p6), %s1478_s13, 1024, %s1483_s7, %s706_s25, %s1197_s15, %s1197_s15, %s1198_s14  }
 0x273 PF: > { %p958_p11 = scmp.ge.s32.totalorder %s1189_s24, 2  ;;  %s734_s12 = sand.u32 1, %s1177_s21  }
 0x274   : > { %p1547_p13 = scmp.ne.s32.totalorder %s1537_s28, 0  ;;  %s735_s27 = scalar_lea.sflag [#allocation4], %s734_s12 }
 0x276   : > { %p950_p3 = pnand %p958_p11, %p1547_p13 }
 0x278   : > { %1172 = dma.done.wait (!%p950_p3), %s735_s27, 1024  }
 0x279   : > { %1174 = vsyncadd (!%p950_p3), %s735_s27, 4294966272  ;;  %p20_p7 = scmp.ge.s32.totalorder %s1342_s8, 10   ;;  %s1548_s21 = smov %s1181_s22 }
 0x27a   : > { %s1549_s22 = smov %s1185_s23  ;;  %s1550_s23 = smov %s1358_s11 }
 0x27b   : > { %s1551_s24 = smov %s1342_s8  ;;  %22 = sbr.rel (!%p20_p7) target bundleno = 6 (0x6), region = 97 }
 0x282   :  { %740 = vsyncpa [#allocation3], 1 }
 0x283   :  { %742 = vsyncpa [#allocation3 + $0x1], 1 }
 0x284   :  { %743 = vsyncpa [#allocation6], 1 }
 0x285   :  { %744 = vsyncpa [#allocation4], 1 }
 0x286   :  { %746 = vsyncpa [#allocation4 + $0x1], 1 }

</bundles_post_ra>
